<compile_context>
chip_gen: v6e
topology: v6e:2x2x1
jax: 0.10.0
libtpu: 0.0.40
codegen_flags: <defaults>
</compile_context>

<pallas_src>
import jax
import jax.numpy as jnp
from jax.experimental import pallas as pl
from jax.experimental.pallas import tpu as pltpu

_MEAN = (0.0, 0.0, 0.0, 0.0)   # module default
_STD = (0.1, 0.1, 0.2, 0.2)    # module default

_LANE = 128           # lanes per block: one full vreg, multiple of 4 (coords)
_ROW_TILE_MAX = 4096  # sublane rows per block -> 2 MiB f32 blocks


def _per_lane_const(vals, lane):
    """(1, LANE) f32 row equal to vals[lane % 4] (general mean/std support)."""
    c = lane & 3
    out = jnp.full(lane.shape, jnp.float32(vals[3]), jnp.float32)
    for k in (2, 1, 0):
        out = jnp.where(c == k, jnp.float32(vals[k]), out)
    return out


def _decode_kernel(a_ref, r_ref, o_ref):
    # a_ref / r_ref / o_ref: (ROW_TILE, 128) f32, lanes interleaved as
    # [x1 y1 x2 y2 | x1 y1 x2 y2 | ...].
    a = a_ref[...]
    r = r_ref[...]

    # Per-lane constants: computed once per tile on a single (1, 128) row and
    # sublane-broadcast into the tile by the arithmetic below (cheap), instead
    # of per-element iota/compare/select chains.
    lane = jax.lax.broadcasted_iota(jnp.int32, (1, _LANE), 1)
    is_lo = (lane & 2) == 0                          # x1/y1 lanes vs x2/y2 lanes
    std_row = _per_lane_const(_STD, lane)            # (1, 128)
    half_row = jnp.where(is_lo, jnp.float32(-0.5), jnp.float32(0.5))

    # In-vreg lane rotations (XLU slot, ~free); wrapped lanes masked by is_lo.
    def plus2(x):    # value of lane i+2 at lane i
        return pltpu.roll(x, shift=_LANE - 2, axis=1)

    def minus2(x):   # value of lane i-2 at lane i
        return pltpu.roll(x, shift=2, axis=1)

    a_hi = jnp.where(is_lo, plus2(a), a)             # x2/y2 on every lane
    a_lo = jnp.where(is_lo, a, minus2(a))            # x1/y1 on every lane
    size = a_hi - a_lo                               # w on x lanes, h on y lanes
    ctr = a_lo + 0.5 * size                          # ctr_x / ctr_y

    d = r * std_row                                  # scaled regression deltas
    if any(m != 0.0 for m in _MEAN):                 # folded out for default mean=0
        d = d + _per_lane_const(_MEAN, lane)

    d_xy = jnp.where(is_lo, d, minus2(d))            # dx/dy on every lane
    d_wh = jnp.where(is_lo, plus2(d), d)             # dw/dh on every lane

    pred_ctr = ctr + d_xy * size
    pred_size = jnp.exp(d_wh) * size                 # single fused exp per tile
    o_ref[...] = pred_ctr + half_row * pred_size     # unmasked full-width store


def _decode_rows_jnp(a4, r4):
    """Plain-jnp decode of (M, 4) anchors/regressions (tiny unaligned tail)."""
    std = jnp.asarray(_STD, jnp.float32)
    mean = jnp.asarray(_MEAN, jnp.float32)
    w = a4[:, 2] - a4[:, 0]
    h = a4[:, 3] - a4[:, 1]
    cx = a4[:, 0] + 0.5 * w
    cy = a4[:, 1] + 0.5 * h
    d = r4 * std + mean
    pcx = cx + d[:, 0] * w
    pcy = cy + d[:, 1] * h
    pw = jnp.exp(d[:, 2]) * w
    ph = jnp.exp(d[:, 3]) * h
    return jnp.stack([pcx - 0.5 * pw, pcy - 0.5 * ph,
                      pcx + 0.5 * pw, pcy + 0.5 * ph], axis=1)


def generate_predict_boxes(anchors, regressions):
    """anchors, regressions: (B, N, 4) -> predict_boxes (B, N, 4) float32."""
    B, N, C = anchors.shape
    assert C == 4 and regressions.shape == anchors.shape
    anchors = anchors.astype(jnp.float32)
    regressions = regressions.astype(jnp.float32)

    total = B * N * 4
    rows = total // _LANE          # lane-dense rows handled by the kernel
    main = rows * _LANE            # elements handled by the kernel

    if rows == 0:
        # Fewer than 32 boxes: not worth a kernel launch.
        return _decode_rows_jnp(anchors.reshape(-1, 4),
                                regressions.reshape(-1, 4)).reshape(B, N, 4)

    a_flat = anchors.reshape(-1)
    r_flat = regressions.reshape(-1)
    if main == total:              # fast path: bitcast reshapes, zero copies
        a2 = a_flat.reshape(rows, _LANE)
        r2 = r_flat.reshape(rows, _LANE)
    else:
        a2 = a_flat[:main].reshape(rows, _LANE)
        r2 = r_flat[:main].reshape(rows, _LANE)

    row_tile = rows if rows <= _ROW_TILE_MAX else _ROW_TILE_MAX
    grid = (pl.cdiv(rows, row_tile),)       # ragged last block masked by Pallas
    spec = pl.BlockSpec((row_tile, _LANE), lambda i: (i, 0))

    # NOTE(v7x): "parallel" lets the grid shard across both TensorCores; if a
    # hardware trace shows a single-TC loop, switch this axis to
    # pltpu.CORE_PARALLEL (needs on-chip verification, kept portable here).
    out2 = pl.pallas_call(
        _decode_kernel,
        out_shape=jax.ShapeDtypeStruct((rows, _LANE), jnp.float32),
        grid=grid,
        in_specs=[spec, spec],
        out_specs=spec,
        compiler_params=pltpu.CompilerParams(
            dimension_semantics=("parallel",),
            vmem_limit_bytes=48 * 1024 * 1024),
    )(a2, r2)

    out_flat = out2.reshape(-1)
    if main != total:
        tail_out = _decode_rows_jnp(a_flat[main:].reshape(-1, 4),
                                    r_flat[main:].reshape(-1, 4)).reshape(-1)
        out_flat = jnp.concatenate([out_flat, tail_out])
    return out_flat.reshape(B, N, 4)


def _reference(anchors, regressions):
    mean = jnp.asarray(_MEAN, jnp.float32)
    std = jnp.asarray(_STD, jnp.float32)
    widths = anchors[:, :, 2] - anchors[:, :, 0]
    heights = anchors[:, :, 3] - anchors[:, :, 1]
    ctr_x = anchors[:, :, 0] + 0.5 * widths
    ctr_y = anchors[:, :, 1] + 0.5 * heights
    dx = regressions[:, :, 0] * std[0] + mean[0]
    dy = regressions[:, :, 1] * std[1] + mean[1]
    dw = regressions[:, :, 2] * std[2] + mean[2]
    dh = regressions[:, :, 3] * std[3] + mean[3]
    pcx = ctr_x + dx * widths
    pcy = ctr_y + dy * heights
    pw = jnp.exp(dw) * widths
    ph = jnp.exp(dh) * heights
    return jnp.stack([pcx - 0.5 * pw, pcy - 0.5 * ph,
                      pcx + 0.5 * pw, pcy + 0.5 * ph], axis=2)


if __name__ == "__main__":
    key = jax.random.PRNGKey(0)

    def make_inputs(k, B, N):
        k1, k2, k3 = jax.random.split(k, 3)
        xy = jax.random.uniform(k1, (B, N, 2), jnp.float32, 0.0, 100.0)
        wh = jax.random.uniform(k2, (B, N, 2), jnp.float32, 1.0, 50.0)
        anchors = jnp.concatenate([xy, xy + wh], axis=2)        # valid boxes
        regressions = jax.random.normal(k3, (B, N, 4), jnp.float32)
        return anchors, regressions

    k_a, k_b = jax.random.split(key)

    # Aligned fast path (B*N % 32 == 0): whole decode runs in the kernel.
    B, N = 2, 256
    anchors, regressions = make_inputs(k_a, B, N)
    out = generate_predict_boxes(anchors, regressions)
    jax.block_until_ready(out)
    ref = _reference(anchors, regressions)
    assert out.shape == (B, N, 4)
    assert jnp.allclose(out, ref, atol=1e-5, rtol=1e-5)

    # Unaligned shape: kernel decodes the lane-aligned prefix, tiny jnp tail.
    B2, N2 = 1, 270
    anchors2, regressions2 = make_inputs(k_b, B2, N2)
    out2 = generate_predict_boxes(anchors2, regressions2)
    jax.block_until_ready(out2)
    ref2 = _reference(anchors2, regressions2)
    assert out2.shape == (B2, N2, 4)
    assert jnp.allclose(out2, ref2, atol=1e-5, rtol=1e-5)

    print("KERNEL_OK")
</pallas_src>

<mosaic_0001>
module attributes {stable_mosaic.version = 11 : i64} {
  func.func @_decode_kernel(%arg0: i32, %arg1: memref<16x128xf32, #tpu.memory_space<vmem>>, %arg2: memref<16x128xf32, #tpu.memory_space<vmem>>, %arg3: memref<16x128xf32, #tpu.memory_space<vmem>>) attributes {dimension_semantics = [#tpu.dimension_semantics<parallel>], iteration_bounds = array<i64: 1>, scalar_prefetch = 0 : i64, scratch_operands = 0 : i64, tpu.core_type = #tpu.core_type<tc>, window_params = [{transform_indices = @transform_0, window_bounds = array<i64: 16, 128>}, {transform_indices = @transform_1, window_bounds = array<i64: 16, 128>}, {transform_indices = @transform_2, window_bounds = array<i64: 16, 128>}]} {
    %c0 = arith.constant 0 : index
    %c0_0 = arith.constant 0 : index
    %0 = vector.load %arg1[%c0, %c0_0] : memref<16x128xf32, #tpu.memory_space<vmem>>, vector<16x128xf32>
    %c0_1 = arith.constant 0 : index
    %c0_2 = arith.constant 0 : index
    %1 = vector.load %arg2[%c0_1, %c0_2] : memref<16x128xf32, #tpu.memory_space<vmem>>, vector<16x128xf32>
    %2 = tpu.iota {dimensions = array<i32: 1>} : vector<1x128xi32>
    %c2_i32 = arith.constant 2 : i32
    %3 = vector.broadcast %c2_i32 : i32 to vector<1x128xi32>
    %4 = arith.andi %2, %3 : vector<1x128xi32>
    %c0_i32 = arith.constant 0 : i32
    %5 = vector.broadcast %c0_i32 : i32 to vector<1x128xi32>
    %6 = arith.cmpi eq, %4, %5 : vector<1x128xi32>
    %c3_i32 = arith.constant 3 : i32
    %7 = vector.broadcast %c3_i32 : i32 to vector<1x128xi32>
    %8 = arith.andi %2, %7 : vector<1x128xi32>
    %cst = arith.constant 2.000000e-01 : f32
    %9 = vector.broadcast %cst : f32 to vector<1x128xf32>
    %c2_i32_3 = arith.constant 2 : i32
    %10 = vector.broadcast %c2_i32_3 : i32 to vector<1x128xi32>
    %11 = arith.cmpi eq, %8, %10 : vector<1x128xi32>
    %cst_4 = arith.constant 2.000000e-01 : f32
    %12 = vector.broadcast %cst_4 : f32 to vector<1x128xf32>
    %13 = arith.select %11, %12, %9 : vector<1x128xi1>, vector<1x128xf32>
    %c1_i32 = arith.constant 1 : i32
    %14 = vector.broadcast %c1_i32 : i32 to vector<1x128xi32>
    %15 = arith.cmpi eq, %8, %14 : vector<1x128xi32>
    %cst_5 = arith.constant 1.000000e-01 : f32
    %16 = vector.broadcast %cst_5 : f32 to vector<1x128xf32>
    %17 = arith.select %15, %16, %13 : vector<1x128xi1>, vector<1x128xf32>
    %c0_i32_6 = arith.constant 0 : i32
    %18 = vector.broadcast %c0_i32_6 : i32 to vector<1x128xi32>
    %19 = arith.cmpi eq, %8, %18 : vector<1x128xi32>
    %cst_7 = arith.constant 1.000000e-01 : f32
    %20 = vector.broadcast %cst_7 : f32 to vector<1x128xf32>
    %21 = arith.select %19, %20, %17 : vector<1x128xi1>, vector<1x128xf32>
    %cst_8 = arith.constant -5.000000e-01 : f32
    %cst_9 = arith.constant 5.000000e-01 : f32
    %22 = vector.broadcast %cst_8 : f32 to vector<1x128xf32>
    %23 = vector.broadcast %cst_9 : f32 to vector<1x128xf32>
    %24 = arith.select %6, %22, %23 : vector<1x128xi1>, vector<1x128xf32>
    %c126_i32 = arith.constant 126 : i32
    %25 = tpu.dynamic_rotate %0 by %c126_i32 dim 1 : vector<16x128xf32>, i32 -> vector<16x128xf32>
    %26 = vector.shape_cast %6 : vector<1x128xi1> to vector<1x128xi1>
    %27 = vector.broadcast %26 : vector<1x128xi1> to vector<16x128xi1>
    %28 = arith.select %27, %25, %0 : vector<16x128xi1>, vector<16x128xf32>
    %c2_i32_10 = arith.constant 2 : i32
    %29 = tpu.dynamic_rotate %0 by %c2_i32_10 dim 1 : vector<16x128xf32>, i32 -> vector<16x128xf32>
    %30 = vector.shape_cast %6 : vector<1x128xi1> to vector<1x128xi1>
    %31 = vector.broadcast %30 : vector<1x128xi1> to vector<16x128xi1>
    %32 = arith.select %31, %0, %29 : vector<16x128xi1>, vector<16x128xf32>
    %33 = arith.subf %28, %32 : vector<16x128xf32>
    %cst_11 = arith.constant 5.000000e-01 : f32
    %34 = vector.broadcast %cst_11 : f32 to vector<16x128xf32>
    %35 = arith.mulf %34, %33 : vector<16x128xf32>
    %36 = arith.addf %32, %35 : vector<16x128xf32>
    %37 = vector.broadcast %21 : vector<1x128xf32> to vector<16x128xf32>
    %38 = arith.mulf %1, %37 : vector<16x128xf32>
    %c2_i32_12 = arith.constant 2 : i32
    %39 = tpu.dynamic_rotate %38 by %c2_i32_12 dim 1 : vector<16x128xf32>, i32 -> vector<16x128xf32>
    %40 = vector.shape_cast %6 : vector<1x128xi1> to vector<1x128xi1>
    %41 = vector.broadcast %40 : vector<1x128xi1> to vector<16x128xi1>
    %42 = arith.select %41, %38, %39 : vector<16x128xi1>, vector<16x128xf32>
    %c126_i32_13 = arith.constant 126 : i32
    %43 = tpu.dynamic_rotate %38 by %c126_i32_13 dim 1 : vector<16x128xf32>, i32 -> vector<16x128xf32>
    %44 = vector.shape_cast %6 : vector<1x128xi1> to vector<1x128xi1>
    %45 = vector.broadcast %44 : vector<1x128xi1> to vector<16x128xi1>
    %46 = arith.select %45, %43, %38 : vector<16x128xi1>, vector<16x128xf32>
    %47 = arith.mulf %42, %33 : vector<16x128xf32>
    %48 = arith.addf %36, %47 : vector<16x128xf32>
    %49 = math.exp %46 : vector<16x128xf32>
    %50 = arith.mulf %49, %33 : vector<16x128xf32>
    %51 = vector.broadcast %24 : vector<1x128xf32> to vector<16x128xf32>
    %52 = arith.mulf %51, %50 : vector<16x128xf32>
    %53 = arith.addf %48, %52 : vector<16x128xf32>
    %c0_14 = arith.constant 0 : index
    %c0_15 = arith.constant 0 : index
    %54 = vector.load %arg3[%c0_14, %c0_15] : memref<16x128xf32, #tpu.memory_space<vmem>>, vector<16x128xf32>
    tpu.vector_store %arg3[%c0_14, %c0_15], %53 {strides = array<i32>} : memref<16x128xf32, #tpu.memory_space<vmem>>, vector<16x128xf32>,
    return
  }
  func.func @transform_0(%arg0: i32) -> (i32, i32) {
    %c0_i32 = arith.constant 0 : i32
    %c0_i32_0 = arith.constant 0 : i32
    return %arg0, %c0_i32 : i32, i32
  }
  func.func @transform_1(%arg0: i32) -> (i32, i32) {
    %c0_i32 = arith.constant 0 : i32
    %c0_i32_0 = arith.constant 0 : i32
    return %arg0, %c0_i32 : i32, i32
  }
  func.func @transform_2(%arg0: i32) -> (i32, i32) {
    %c0_i32 = arith.constant 0 : i32
    %c0_i32_0 = arith.constant 0 : i32
    return %arg0, %c0_i32 : i32, i32
  }
}

</mosaic_0001>

<bundles_post_ra>
// kernel: tpu_custom_call.1
= control target key start
LH: loop header
LB: loop body
LE: loop exit
PB: predicated region body
PF: predicated region fallthrough
CT: control target
= control target key end

     0   :  { %7 = vsyncpa [#allocation3], 0  ;;  %s265_s0 = inlined_call_operand.hbm [shape: f32[16,128], index: 0, kind: input, shape index: {}]   ;;  %s266_s1 = inlined_call_operand.hbm [shape: f32[16,128], index: 1, kind: input, shape index: {}]   ;;  %s267_s2 = inlined_call_operand.hbm [shape: f32[16,128], index: 2, kind: output, shape index: {}]  }
   0x1   :  { %8 = vsyncpa [#allocation6], 0 }
   0x2   :  { %9 = vsyncpa [#allocation4], 0  ;;  %s201_s9 = smov [#allocation2]  }
   0x3   :  { %s15_s10 = sshll.u32 %s201_s9, 4  ;;  %s16_s10 = int_to_ptr.vmem [resolvable:$true] %s15_s10 }
   0x4   :  { %s143_s11 = scalar_lea.vmem %s16_s10, 256  ;;  %p148_p1 = scmp.lt.s32.totalorder %s16_s10, %s16_s10 }
   0x5   :  { %p144_p0 = scmp.ne.s32.totalorder %s16_s10, %s143_s11  ;;  %p149_p2 = scmp.lt.s32.totalorder %s143_s11, %s143_s11 }
   0x7   :  { %p150_p3 = por %p149_p2, %p148_p1 }
   0x9   :  { %p151_p4 = pnand %p150_p3, %p144_p0 }
   0xb   :  { %154 = shalt.err (!%p151_p4)
}
   0xc   :  { %s202_s12 = smov 128   ;;  %s203_s13 = smov 8  }
   0xd   :  { %21 = dma.hbm_to_vmem [thread:$0]  %s265_s0, 256, %s16_s10, [#allocation3], %s202_s12, %s202_s12, %s203_s13  }
   0xe   :  { %s204_s16 = smov [#allocation5]  }
   0xf   :  { %s27_s17 = sshll.u32 %s204_s16, 4  ;;  %s28_s17 = int_to_ptr.vmem [resolvable:$true] %s27_s17 }
  0x10   :  { %s163_s18 = scalar_lea.vmem %s28_s17, 256  ;;  %p168_p6 = scmp.lt.s32.totalorder %s28_s17, %s28_s17 }
  0x11   :  { %p164_p5 = scmp.ne.s32.totalorder %s28_s17, %s163_s18  ;;  %p169_p7 = scmp.lt.s32.totalorder %s163_s18, %s163_s18 }
  0x13   :  { %p170_p8 = por %p169_p7, %p168_p6 }
  0x15   :  { %p171_p9 = pnand %p170_p8, %p164_p5 }
  0x17   :  { %174 = shalt.err (!%p171_p9)
}
  0x18   :  { %33 = dma.hbm_to_vmem [thread:$0]  %s266_s1, 256, %s28_s17, [#allocation6], %s202_s12, %s202_s12, %s203_s13  }
  0x19   :  { %195 = dma.done.wait [#allocation3], 256  }
  0x1a   :  { %196 = vsyncadd [#allocation3], 4294967040 }
  0x1b   :  { %197 = dma.done.wait [#allocation6], 256  }
  0x1c   :  { %198 = vsyncadd [#allocation6], 4294967040  ;;  %v44_v0 = vlaneseq  ;;  %v42_v3 = vld [vmem:[#allocation5] sm:$0xff]  ;;  %v205_v4 = vmov 0.2   ;;  %v40_v6 = vld [vmem:[#allocation2] sm:$0xff] }
  0x1d   :  { %s206_s0 = smov 126   ;;  %v43_v8 = vld [vmem:[#allocation5 + $0x8] sm:$0xff]  ;;  %v41_v10 = vld [vmem:[#allocation2 + $0x8] sm:$0xff]  ;;  %s207_s1 = smov 2   ;;  %v208_v39 = vmov 0.5  }
  0x1e   :  { %v45_v1 = vand.u32 127, %v44_v0  ;;  %54 = vrot.lane.b32.xlu1 %v40_v6, %s206_s0  ;;  %s209_s21 = smov [#allocation7]  }
  0x1f   :  { %s109_s22 = sshll.u32 %s209_s21, 4  ;;  %s110_s22 = int_to_ptr.vmem [resolvable:$true] %s109_s22 }
  0x20   :  { %v48_v2 = vand.u32 3, %v45_v1  ;;  %v46_v12 = vand.u32 2, %v45_v1  ;;  %s175_s23 = scalar_lea.vmem %s110_s22, 256  ;;  %p180_p11 = scmp.lt.s32.totalorder %s110_s22, %s110_s22 }
  0x21   :  { %p176_p10 = scmp.ne.s32.totalorder %s110_s22, %s175_s23  ;;  %p181_p12 = scmp.lt.s32.totalorder %s175_s23, %s175_s23 }
  0x22   :  { %vm49_vm0 = vcmp.eq.s32.totalorder %v48_v2, 1  ;;  %vm51_vm1 = vcmp.eq.s32.totalorder %v48_v2, 0  ;;  %56 = vrot.lane.b32.xlu1 %v41_v10, %s206_s0  ;;  %vm237_vm2 = vcmp.eq.s32.totalorder %v46_v12, 0 }
  0x23   :  { %v50_v5 = vsel %vm49_vm0, 0.1, %v205_v4  ;;  %v53_v40 = vsel %vm237_vm2, -0.5, %v208_v39  ;;  %p182_p13 = por %p181_p12, %p180_p11 }
  0x24   :  { %v52_v7 = vsel %vm51_vm1, 0.1, %v50_v5 }
  0x25   :  { %v74_v9 = vmul.f32 %v52_v7, %v42_v3  ;;  %v75_v11 = vmul.f32 %v52_v7, %v43_v8  ;;  %p183_p0 = pnand %p182_p13, %p176_p10 }
  0x26   :  { %64 = vrot.lane.b32.xlu1 %v41_v10, %s207_s1 }
  0x27   :  { %82 = vrot.lane.b32.xlu0 %v74_v9, %s206_s0 }
  0x2a   :  { %78 = vrot.lane.b32.xlu1 %v75_v11, %s207_s1 }
  0x2b   :  { %84 = vrot.lane.b32.xlu0 %v75_v11, %s206_s0 }
  0x2f   :  { %62 = vrot.lane.b32.xlu0 %v40_v6, %s207_s1 }
  0x33   :  { %76 = vrot.lane.b32.xlu0 %v74_v9, %s207_s1 }
  0x90   :  { %v55_v13 = vpop.permute.xlu1 %54 }
  0x91   :  { %v60_v23 = vsel %vm237_vm2, %v55_v13, %v40_v6 }
  0x94   :  { %v57_v17 = vpop.permute.xlu1 %56 }
  0x95   :  { %v61_v25 = vsel %vm237_vm2, %v57_v17, %v41_v10 }
  0x98   :  { %v65_v22 = vpop.permute.xlu1 %64 }
  0x99   :  { %v83_v15 = vpop.permute.xlu0 %82  ;;  %v67_v27 = vsel %vm237_vm2, %v41_v10, %v65_v22 }
  0x9a   :  { %v86_v16 = vsel %vm237_vm2, %v83_v15, %v74_v9  ;;  %v69_v30 = vsub.f32 %v61_v25, %v67_v27 }
  0x9b   :  { %v92_v18 = vmul.f32 1.442695, %v86_v16 }
  0x9c   :  { %v79_v33 = vpop.permute.xlu1 %78  ;;  %v71_v35 = vmul.f32 0.5, %v69_v30 }
  0x9d   :  { %131 = vpow2.f32 %v92_v18  ;;  %v85_v19 = vpop.permute.xlu0 %84  ;;  %v81_v38 = vsel %vm237_vm2, %v75_v11, %v79_v33 }
  0x9e   :  { %v87_v20 = vsel %vm237_vm2, %v85_v19, %v75_v11  ;;  %v73_v42 = vadd.f32 %v71_v35, %v67_v27  ;;  %v89_v44 = vmul.f32 %v81_v38, %v69_v30 }
  0x9f   :  { %v94_v21 = vmul.f32 1.442695, %v87_v20 }
  0xa0   :  { %v91_v49 = vadd.f32 %v89_v44, %v73_v42 }
  0xa1   :  { %133 = vpow2.f32 %v94_v21  ;;  %v63_v24 = vpop.permute.xlu0 %62 }
  0xa2   :  { %v66_v26 = vsel %vm237_vm2, %v40_v6, %v63_v24 }
  0xa3   :  { %v68_v28 = vsub.f32 %v60_v23, %v66_v26 }
  0xa5   :  { %v70_v29 = vmul.f32 0.5, %v68_v28  ;;  %v77_v31 = vpop.permute.xlu0 %76 }
  0xa6   :  { %v80_v32 = vsel %vm237_vm2, %v74_v9, %v77_v31 }
  0xa7   :  { %v72_v34 = vadd.f32 %v70_v29, %v66_v26  ;;  %v88_v36 = vmul.f32 %v80_v32, %v68_v28 }
  0xa9   :  { %v90_v43 = vadd.f32 %v88_v36, %v72_v34 }
  0xaa   :  { %v132_v37 = vpop.eup %131 }
  0xab   :  { %v96_v41 = vmul.f32 %v132_v37, %v68_v28 }
  0xad   :  { %v98_v45 = vmul.f32 %v96_v41, %v53_v40 }
  0xae   :  { %v134_v46 = vpop.eup %133 }
  0xaf   :  { %v97_v47 = vmul.f32 %v134_v46, %v69_v30  ;;  %v100_v48 = vadd.f32 %v98_v45, %v90_v43 }
  0xb1   :  { %v99_v50 = vmul.f32 %v97_v47, %v53_v40  ;;  %102 = vst [vmem:[#allocation7] sm:$0xff] %v100_v48 }
  0xb3   :  { %v101_v51 = vadd.f32 %v99_v50, %v91_v49 }
  0xb5   :  { %103 = vst [vmem:[#allocation7 + $0x8] sm:$0xff] %v101_v51 }
  0xb6   :  { %186 = shalt.err (!%p183_p0)
}
  0xb7   :  { %115 = dma.vmem_to_hbm [thread:$0]  %s110_s22, 256, %s267_s2, [#allocation4], %s202_s12, %s202_s12, %s203_s13  }
  0xb8   :  { %199 = dma.done.wait [#allocation4], 256  }
  0xb9   :  { %200 = vsyncadd [#allocation4], 4294967040 }
  0xba   :  { %119 = vsyncpa [#allocation3], 1 }
  0xbb   :  { %120 = vsyncpa [#allocation6], 1 }
  0xbc   :  { %121 = vsyncpa [#allocation4], 1 }

</bundles_post_ra>
